<compile_context>
chip_gen: v7x
topology: tpu7x:2x2x1
jax: 0.10.0
libtpu: 0.0.40
codegen_flags: <defaults>
</compile_context>

<pallas_src>
import functools

import numpy as np
import jax
import jax.numpy as jnp
from jax import lax
from jax.experimental import pallas as pl
from jax.experimental.pallas import tpu as pltpu

_EPS = 1e-5  # PyTorch BatchNorm1d default eps


def _conv_bn_relu(h, w_ref, g_ref, beta_ref, keep_first, keep_last, valid, inv_n):
    """Conv1d(k=3, s=1, p=1) + BatchNorm1d(train) + ReLU on a (Cin, NLp) tile.

    h:          (Cin, NLp) activations (float32), lane-padded
    w_ref:      (3*Cout, Cin) stacked conv taps; rows [k*Cout:(k+1)*Cout] are tap k,
                and tap k multiplies x[:, l + k - 1]
    g_ref:      (Cout, 1) BN gamma
    beta_ref:   (Cout, 1) BN beta
    keep_first: (1, NLp) 0.0 at sequence starts (l == 0), else 1.0
    keep_last:  (1, NLp) 0.0 at sequence ends (l == L-1), else 1.0
    valid:      (1, NLp) 1.0 for real (unpadded) positions, else 0.0
    inv_n:      static 1 / (N*L)  -- true element count for BN statistics
    """
    cout = w_ref.shape[0] // 3
    nlp = h.shape[1]

    # Single stacked MXU matmul for all 3 taps.
    y_all = jnp.dot(w_ref[...], h, preferred_element_type=jnp.float32)  # (3*Cout, NLp)
    y0 = y_all[0 * cout:1 * cout]   # tap for x[l-1]
    y1 = y_all[1 * cout:2 * cout]   # tap for x[l]
    y2 = y_all[2 * cout:3 * cout]   # tap for x[l+1]

    # out[:, l] = y0[:, l-1] + y1[:, l] + y2[:, l+1] with zero padding at every
    # length-L sequence boundary.  pltpu.roll wraps; the masks zero the wrapped
    # and cross-sequence elements.  Shifts kept non-negative.
    y = (pltpu.roll(y0, 1, axis=1) * keep_first
         + y1
         + pltpu.roll(y2, nlp - 1, axis=1) * keep_last)
    # Conv bias intentionally omitted: exactly cancelled by the BN mean
    # subtraction in training mode.

    # Fused BatchNorm1d (training mode), one pass, padded columns excluded.
    ym = y * valid
    s = jnp.sum(ym, axis=1, keepdims=True)
    ss = jnp.sum(ym * y, axis=1, keepdims=True)          # valid is {0,1} -> y^2*valid
    mean = s * inv_n
    var = jnp.maximum(ss * inv_n - mean * mean, 0.0)
    scale = g_ref[...] * lax.rsqrt(var + _EPS)
    shift = beta_ref[...] - mean * scale
    return jnp.maximum(y * scale + shift, 0.0)


def _cnn_kernel(x_ref, kf_ref, kl_ref, valid_ref,
                w1_ref, g1_ref, be1_ref,
                w2_ref, g2_ref, be2_ref,
                w3_ref, g3_ref, be3_ref,
                o_ref, *, inv_n):
    h = x_ref[...].astype(jnp.float32)
    kf = kf_ref[...]
    kl = kl_ref[...]
    valid = valid_ref[...]
    h = _conv_bn_relu(h, w1_ref, g1_ref, be1_ref, kf, kl, valid, inv_n)
    h = _conv_bn_relu(h, w2_ref, g2_ref, be2_ref, kf, kl, valid, inv_n)
    h = _conv_bn_relu(h, w3_ref, g3_ref, be3_ref, kf, kl, valid, inv_n)
    o_ref[...] = h.astype(o_ref.dtype)


def _full_spec(shape):
    n = len(shape)
    return pl.BlockSpec(shape, lambda i, n=n: (0,) * n)


def cnnnet_forward(x, params):
    """x: (N, 64, L) float32; params: 3 tuples of (w (Cout,Cin,3), bias, gamma, beta)."""
    N, cin, L = x.shape
    nl = N * L
    nlp = max(128, ((nl + 127) // 128) * 128)            # lane-aligned padded width

    x_flat = jnp.transpose(x, (1, 0, 2)).reshape(cin, nl)
    if nlp != nl:
        x_flat = jnp.pad(x_flat, ((0, 0), (0, nlp - nl)))

    # Sequence-boundary + validity masks, built once in the wrapper.
    idx = jnp.arange(nlp, dtype=jnp.int32)
    pos = idx % L
    keep_first = jnp.where(pos == 0, 0.0, 1.0).astype(jnp.float32).reshape(1, nlp)
    keep_last = jnp.where(pos == L - 1, 0.0, 1.0).astype(jnp.float32).reshape(1, nlp)
    valid = (idx < nl).astype(jnp.float32).reshape(1, nlp)

    kernel_args = [x_flat, keep_first, keep_last, valid]
    vmem_bytes = (cin + 3) * nlp * 4                       # input + masks
    for (w, b, g, beta) in params:
        del b  # conv bias is cancelled by training-mode BN mean subtraction
        cout, w_cin, _ = w.shape
        # torch (Cout, Cin, K=3) -> stacked (3*Cout, Cin); rows [k*Cout:(k+1)*Cout] = tap k
        w_stacked = jnp.transpose(w, (2, 0, 1)).reshape(3 * cout, w_cin)
        kernel_args.append(w_stacked)
        kernel_args.append(g.reshape(cout, 1))
        kernel_args.append(beta.reshape(cout, 1))
        vmem_bytes += (4 * cout) * nlp * 4 + 3 * cout * w_cin * 4  # taps + act + weights

    # Explicit scoped-VMEM budget: live footprint x4 slack, clamped below the
    # smallest physical VMEM (v7x: 64 MiB per TC).
    vmem_limit = int(min(max(4 * vmem_bytes + (1 << 20), 8 << 20), 48 << 20))

    kernel = functools.partial(_cnn_kernel, inv_n=1.0 / float(nl))

    out_flat = pl.pallas_call(
        kernel,
        out_shape=jax.ShapeDtypeStruct((1, nlp), jnp.float32),
        grid=(1,),
        in_specs=[_full_spec(a.shape) for a in kernel_args],
        out_specs=_full_spec((1, nlp)),
        compiler_params=pltpu.CompilerParams(
            dimension_semantics=("arbitrary",),
            vmem_limit_bytes=vmem_limit),
    )(*kernel_args)

    out_flat = out_flat[:, :nl]
    return jnp.transpose(out_flat.reshape(1, N, L), (1, 0, 2))  # (N, 1, L), NCL


def ref_forward(x, params):
    """Pure-JAX reference (NCL layout), same training-mode BN semantics (with bias)."""
    h = x
    for (w, b, g, beta) in params:
        y = lax.conv_general_dilated(
            h, w, window_strides=(1,), padding=((1, 1),),
            dimension_numbers=("NCH", "OIH", "NCH"))
        y = y + b[None, :, None]
        mean = jnp.mean(y, axis=(0, 2), keepdims=True)
        var = jnp.mean((y - mean) ** 2, axis=(0, 2), keepdims=True)
        y = (y - mean) * lax.rsqrt(var + _EPS) * g[None, :, None] + beta[None, :, None]
        h = jnp.maximum(y, 0.0)
    return h


if __name__ == "__main__":
    key = jax.random.PRNGKey(0)
    keys = jax.random.split(key, 16)

    layer_dims = [(64, 32), (32, 16), (16, 1)]
    params = []
    ki = 1
    for cin, cout in layer_dims:
        w = jax.random.normal(keys[ki], (cout, cin, 3), jnp.float32) / jnp.sqrt(cin * 3.0); ki += 1
        b = 0.1 * jax.random.normal(keys[ki], (cout,), jnp.float32); ki += 1
        g = 1.0 + 0.1 * jax.random.normal(keys[ki], (cout,), jnp.float32); ki += 1
        beta = 0.1 * jax.random.normal(keys[ki], (cout,), jnp.float32); ki += 1
        params.append((w, b, g, beta))

    # Case 1: N*L already a multiple of 128 (no padding path).
    N, L = 2, 128
    x = jax.random.normal(keys[0], (N, 64, L), jnp.float32)
    out = cnnnet_forward(x, params)
    jax.block_until_ready(out)
    assert out.shape == (N, 1, L), out.shape
    ref = ref_forward(x, params)
    np.testing.assert_allclose(np.asarray(out), np.asarray(ref), atol=2e-3, rtol=2e-3)

    # Case 2: N*L not a multiple of 128 (exercises lane padding + BN valid mask).
    N2, L2 = 3, 50
    x2 = jax.random.normal(keys[13], (N2, 64, L2), jnp.float32)
    out2 = cnnnet_forward(x2, params)
    jax.block_until_ready(out2)
    assert out2.shape == (N2, 1, L2), out2.shape
    ref2 = ref_forward(x2, params)
    np.testing.assert_allclose(np.asarray(out2), np.asarray(ref2), atol=2e-3, rtol=2e-3)

    print("KERNEL_OK")
</pallas_src>

<mosaic_0001>
module attributes {stable_mosaic.version = 11 : i64} {
  func.func @_cnn_kernel(%arg0: i32, %arg1: memref<64x256xf32, #tpu.memory_space<vmem>>, %arg2: memref<1x256xf32, #tpu.memory_space<vmem>>, %arg3: memref<1x256xf32, #tpu.memory_space<vmem>>, %arg4: memref<1x256xf32, #tpu.memory_space<vmem>>, %arg5: memref<96x64xf32, #tpu.memory_space<vmem>>, %arg6: memref<32x1xf32, #tpu.memory_space<vmem>>, %arg7: memref<32x1xf32, #tpu.memory_space<vmem>>, %arg8: memref<48x32xf32, #tpu.memory_space<vmem>>, %arg9: memref<16x1xf32, #tpu.memory_space<vmem>>, %arg10: memref<16x1xf32, #tpu.memory_space<vmem>>, %arg11: memref<3x16xf32, #tpu.memory_space<vmem>>, %arg12: memref<1x1xf32, #tpu.memory_space<vmem>>, %arg13: memref<1x1xf32, #tpu.memory_space<vmem>>, %arg14: memref<1x256xf32, #tpu.memory_space<vmem>>) attributes {dimension_semantics = [#tpu.dimension_semantics<arbitrary>], iteration_bounds = array<i64: 1>, scalar_prefetch = 0 : i64, scratch_operands = 0 : i64, tpu.core_type = #tpu.core_type<tc>, window_params = [{pipeline_mode = #tpu.pipeline_mode<synchronous>, transform_indices = @transform_0, window_bounds = array<i64: 64, 256>}, {pipeline_mode = #tpu.pipeline_mode<synchronous>, transform_indices = @transform_1, window_bounds = array<i64: 1, 256>}, {pipeline_mode = #tpu.pipeline_mode<synchronous>, transform_indices = @transform_2, window_bounds = array<i64: 1, 256>}, {pipeline_mode = #tpu.pipeline_mode<synchronous>, transform_indices = @transform_3, window_bounds = array<i64: 1, 256>}, {pipeline_mode = #tpu.pipeline_mode<synchronous>, transform_indices = @transform_4, window_bounds = array<i64: 96, 64>}, {pipeline_mode = #tpu.pipeline_mode<synchronous>, transform_indices = @transform_5, window_bounds = array<i64: 32, 1>}, {pipeline_mode = #tpu.pipeline_mode<synchronous>, transform_indices = @transform_6, window_bounds = array<i64: 32, 1>}, {pipeline_mode = #tpu.pipeline_mode<synchronous>, transform_indices = @transform_7, window_bounds = array<i64: 48, 32>}, {pipeline_mode = #tpu.pipeline_mode<synchronous>, transform_indices = @transform_8, window_bounds = array<i64: 16, 1>}, {pipeline_mode = #tpu.pipeline_mode<synchronous>, transform_indices = @transform_9, window_bounds = array<i64: 16, 1>}, {pipeline_mode = #tpu.pipeline_mode<synchronous>, transform_indices = @transform_10, window_bounds = array<i64: 3, 16>}, {pipeline_mode = #tpu.pipeline_mode<synchronous>, transform_indices = @transform_11, window_bounds = array<i64: 1, 1>}, {pipeline_mode = #tpu.pipeline_mode<synchronous>, transform_indices = @transform_12, window_bounds = array<i64: 1, 1>}, {pipeline_mode = #tpu.pipeline_mode<synchronous>, transform_indices = @transform_13, window_bounds = array<i64: 1, 256>}]} {
    %c0 = arith.constant 0 : index
    %c0_0 = arith.constant 0 : index
    %0 = vector.load %arg1[%c0, %c0_0] : memref<64x256xf32, #tpu.memory_space<vmem>>, vector<64x256xf32>
    %c0_1 = arith.constant 0 : index
    %c0_2 = arith.constant 0 : index
    %1 = vector.load %arg2[%c0_1, %c0_2] : memref<1x256xf32, #tpu.memory_space<vmem>>, vector<1x256xf32>
    %c0_3 = arith.constant 0 : index
    %c0_4 = arith.constant 0 : index
    %2 = vector.load %arg3[%c0_3, %c0_4] : memref<1x256xf32, #tpu.memory_space<vmem>>, vector<1x256xf32>
    %c0_5 = arith.constant 0 : index
    %c0_6 = arith.constant 0 : index
    %3 = vector.load %arg4[%c0_5, %c0_6] : memref<1x256xf32, #tpu.memory_space<vmem>>, vector<1x256xf32>
    %c0_7 = arith.constant 0 : index
    %c0_8 = arith.constant 0 : index
    %4 = vector.load %arg5[%c0_7, %c0_8] : memref<96x64xf32, #tpu.memory_space<vmem>>, vector<96x64xf32>
    %cst = arith.constant dense<0.000000e+00> : vector<96x256xf32>
    %5 = tpu.matmul %4, %0, %cst {dimension_numbers = #tpu.dot_dimension_numbers<[1], [0], [0], [1], [0, 0, 1, 1], [], []>} : vector<96x64xf32>, vector<64x256xf32>, vector<96x256xf32> -> vector<96x256xf32>
    %6 = vector.extract_strided_slice %5 {offsets = [0, 0], sizes = [32, 256], strides = [1, 1]} : vector<96x256xf32> to vector<32x256xf32>
    %7 = vector.extract_strided_slice %5 {offsets = [32, 0], sizes = [32, 256], strides = [1, 1]} : vector<96x256xf32> to vector<32x256xf32>
    %8 = vector.extract_strided_slice %5 {offsets = [64, 0], sizes = [32, 256], strides = [1, 1]} : vector<96x256xf32> to vector<32x256xf32>
    %c1_i32 = arith.constant 1 : i32
    %9 = tpu.dynamic_rotate %6 by %c1_i32 dim 1 : vector<32x256xf32>, i32 -> vector<32x256xf32>
    %10 = vector.broadcast %1 : vector<1x256xf32> to vector<32x256xf32>
    %11 = arith.mulf %9, %10 : vector<32x256xf32>
    %12 = arith.addf %11, %7 : vector<32x256xf32>
    %c255_i32 = arith.constant 255 : i32
    %13 = tpu.dynamic_rotate %8 by %c255_i32 dim 1 : vector<32x256xf32>, i32 -> vector<32x256xf32>
    %14 = vector.broadcast %2 : vector<1x256xf32> to vector<32x256xf32>
    %15 = arith.mulf %13, %14 : vector<32x256xf32>
    %16 = arith.addf %12, %15 : vector<32x256xf32>
    %17 = vector.broadcast %3 : vector<1x256xf32> to vector<32x256xf32>
    %18 = arith.mulf %16, %17 : vector<32x256xf32>
    %cst_9 = arith.constant dense<0.000000e+00> : vector<32xf32>
    %19 = vector.multi_reduction <add>, %18, %cst_9 [1] : vector<32x256xf32> to vector<32xf32>
    %20 = vector.shape_cast %19 : vector<32xf32> to vector<32x1xf32>
    %21 = arith.mulf %18, %16 : vector<32x256xf32>
    %cst_10 = arith.constant dense<0.000000e+00> : vector<32xf32>
    %22 = vector.multi_reduction <add>, %21, %cst_10 [1] : vector<32x256xf32> to vector<32xf32>
    %23 = vector.shape_cast %22 : vector<32xf32> to vector<32x1xf32>
    %cst_11 = arith.constant 3.906250e-03 : f32
    %24 = vector.broadcast %cst_11 : f32 to vector<32x1xf32>
    %25 = arith.mulf %20, %24 : vector<32x1xf32>
    %cst_12 = arith.constant 3.906250e-03 : f32
    %26 = vector.broadcast %cst_12 : f32 to vector<32x1xf32>
    %27 = arith.mulf %23, %26 : vector<32x1xf32>
    %28 = arith.mulf %25, %25 : vector<32x1xf32>
    %29 = arith.subf %27, %28 : vector<32x1xf32>
    %cst_13 = arith.constant 0.000000e+00 : f32
    %30 = vector.broadcast %cst_13 : f32 to vector<32x1xf32>
    %31 = arith.maximumf %29, %30 : vector<32x1xf32>
    %c0_14 = arith.constant 0 : index
    %c0_15 = arith.constant 0 : index
    %32 = vector.load %arg6[%c0_14, %c0_15] : memref<32x1xf32, #tpu.memory_space<vmem>>, vector<32x1xf32>
    %cst_16 = arith.constant 9.99999974E-6 : f32
    %33 = vector.broadcast %cst_16 : f32 to vector<32x1xf32>
    %34 = arith.addf %31, %33 : vector<32x1xf32>
    %35 = math.rsqrt %34 : vector<32x1xf32>
    %36 = arith.mulf %32, %35 : vector<32x1xf32>
    %c0_17 = arith.constant 0 : index
    %c0_18 = arith.constant 0 : index
    %37 = vector.load %arg7[%c0_17, %c0_18] : memref<32x1xf32, #tpu.memory_space<vmem>>, vector<32x1xf32>
    %38 = arith.mulf %25, %36 : vector<32x1xf32>
    %39 = arith.subf %37, %38 : vector<32x1xf32>
    %40 = vector.broadcast %36 : vector<32x1xf32> to vector<32x256xf32>
    %41 = arith.mulf %16, %40 : vector<32x256xf32>
    %42 = vector.broadcast %39 : vector<32x1xf32> to vector<32x256xf32>
    %43 = arith.addf %41, %42 : vector<32x256xf32>
    %cst_19 = arith.constant 0.000000e+00 : f32
    %44 = vector.broadcast %cst_19 : f32 to vector<32x256xf32>
    %45 = arith.maximumf %43, %44 : vector<32x256xf32>
    %c0_20 = arith.constant 0 : index
    %c0_21 = arith.constant 0 : index
    %46 = vector.load %arg8[%c0_20, %c0_21] : memref<48x32xf32, #tpu.memory_space<vmem>>, vector<48x32xf32>
    %cst_22 = arith.constant dense<0.000000e+00> : vector<48x256xf32>
    %47 = tpu.matmul %46, %45, %cst_22 {dimension_numbers = #tpu.dot_dimension_numbers<[1], [0], [0], [1], [0, 0, 1, 1], [], []>} : vector<48x32xf32>, vector<32x256xf32>, vector<48x256xf32> -> vector<48x256xf32>
    %48 = vector.extract_strided_slice %47 {offsets = [0, 0], sizes = [16, 256], strides = [1, 1]} : vector<48x256xf32> to vector<16x256xf32>
    %49 = vector.extract_strided_slice %47 {offsets = [16, 0], sizes = [16, 256], strides = [1, 1]} : vector<48x256xf32> to vector<16x256xf32>
    %50 = vector.extract_strided_slice %47 {offsets = [32, 0], sizes = [16, 256], strides = [1, 1]} : vector<48x256xf32> to vector<16x256xf32>
    %c1_i32_23 = arith.constant 1 : i32
    %51 = tpu.dynamic_rotate %48 by %c1_i32_23 dim 1 : vector<16x256xf32>, i32 -> vector<16x256xf32>
    %52 = vector.broadcast %1 : vector<1x256xf32> to vector<16x256xf32>
    %53 = arith.mulf %51, %52 : vector<16x256xf32>
    %54 = arith.addf %53, %49 : vector<16x256xf32>
    %c255_i32_24 = arith.constant 255 : i32
    %55 = tpu.dynamic_rotate %50 by %c255_i32_24 dim 1 : vector<16x256xf32>, i32 -> vector<16x256xf32>
    %56 = vector.broadcast %2 : vector<1x256xf32> to vector<16x256xf32>
    %57 = arith.mulf %55, %56 : vector<16x256xf32>
    %58 = arith.addf %54, %57 : vector<16x256xf32>
    %59 = vector.broadcast %3 : vector<1x256xf32> to vector<16x256xf32>
    %60 = arith.mulf %58, %59 : vector<16x256xf32>
    %cst_25 = arith.constant dense<0.000000e+00> : vector<16xf32>
    %61 = vector.multi_reduction <add>, %60, %cst_25 [1] : vector<16x256xf32> to vector<16xf32>
    %62 = vector.shape_cast %61 : vector<16xf32> to vector<16x1xf32>
    %63 = arith.mulf %60, %58 : vector<16x256xf32>
    %cst_26 = arith.constant dense<0.000000e+00> : vector<16xf32>
    %64 = vector.multi_reduction <add>, %63, %cst_26 [1] : vector<16x256xf32> to vector<16xf32>
    %65 = vector.shape_cast %64 : vector<16xf32> to vector<16x1xf32>
    %cst_27 = arith.constant 3.906250e-03 : f32
    %66 = vector.broadcast %cst_27 : f32 to vector<16x1xf32>
    %67 = arith.mulf %62, %66 : vector<16x1xf32>
    %cst_28 = arith.constant 3.906250e-03 : f32
    %68 = vector.broadcast %cst_28 : f32 to vector<16x1xf32>
    %69 = arith.mulf %65, %68 : vector<16x1xf32>
    %70 = arith.mulf %67, %67 : vector<16x1xf32>
    %71 = arith.subf %69, %70 : vector<16x1xf32>
    %cst_29 = arith.constant 0.000000e+00 : f32
    %72 = vector.broadcast %cst_29 : f32 to vector<16x1xf32>
    %73 = arith.maximumf %71, %72 : vector<16x1xf32>
    %c0_30 = arith.constant 0 : index
    %c0_31 = arith.constant 0 : index
    %74 = vector.load %arg9[%c0_30, %c0_31] : memref<16x1xf32, #tpu.memory_space<vmem>>, vector<16x1xf32>
    %cst_32 = arith.constant 9.99999974E-6 : f32
    %75 = vector.broadcast %cst_32 : f32 to vector<16x1xf32>
    %76 = arith.addf %73, %75 : vector<16x1xf32>
    %77 = math.rsqrt %76 : vector<16x1xf32>
    %78 = arith.mulf %74, %77 : vector<16x1xf32>
    %c0_33 = arith.constant 0 : index
    %c0_34 = arith.constant 0 : index
    %79 = vector.load %arg10[%c0_33, %c0_34] : memref<16x1xf32, #tpu.memory_space<vmem>>, vector<16x1xf32>
    %80 = arith.mulf %67, %78 : vector<16x1xf32>
    %81 = arith.subf %79, %80 : vector<16x1xf32>
    %82 = vector.broadcast %78 : vector<16x1xf32> to vector<16x256xf32>
    %83 = arith.mulf %58, %82 : vector<16x256xf32>
    %84 = vector.broadcast %81 : vector<16x1xf32> to vector<16x256xf32>
    %85 = arith.addf %83, %84 : vector<16x256xf32>
    %cst_35 = arith.constant 0.000000e+00 : f32
    %86 = vector.broadcast %cst_35 : f32 to vector<16x256xf32>
    %87 = arith.maximumf %85, %86 : vector<16x256xf32>
    %c0_36 = arith.constant 0 : index
    %c0_37 = arith.constant 0 : index
    %88 = vector.load %arg11[%c0_36, %c0_37] : memref<3x16xf32, #tpu.memory_space<vmem>>, vector<3x16xf32>
    %cst_38 = arith.constant dense<0.000000e+00> : vector<3x256xf32>
    %89 = tpu.matmul %88, %87, %cst_38 {dimension_numbers = #tpu.dot_dimension_numbers<[1], [0], [0], [1], [0, 0, 1, 1], [], []>} : vector<3x16xf32>, vector<16x256xf32>, vector<3x256xf32> -> vector<3x256xf32>
    %90 = vector.extract_strided_slice %89 {offsets = [0, 0], sizes = [1, 256], strides = [1, 1]} : vector<3x256xf32> to vector<1x256xf32>
    %91 = vector.extract_strided_slice %89 {offsets = [1, 0], sizes = [1, 256], strides = [1, 1]} : vector<3x256xf32> to vector<1x256xf32>
    %92 = vector.extract_strided_slice %89 {offsets = [2, 0], sizes = [1, 256], strides = [1, 1]} : vector<3x256xf32> to vector<1x256xf32>
    %c1_i32_39 = arith.constant 1 : i32
    %93 = tpu.dynamic_rotate %90 by %c1_i32_39 dim 1 : vector<1x256xf32>, i32 -> vector<1x256xf32>
    %94 = arith.mulf %93, %1 : vector<1x256xf32>
    %95 = arith.addf %94, %91 : vector<1x256xf32>
    %c255_i32_40 = arith.constant 255 : i32
    %96 = tpu.dynamic_rotate %92 by %c255_i32_40 dim 1 : vector<1x256xf32>, i32 -> vector<1x256xf32>
    %97 = arith.mulf %96, %2 : vector<1x256xf32>
    %98 = arith.addf %95, %97 : vector<1x256xf32>
    %99 = arith.mulf %98, %3 : vector<1x256xf32>
    %cst_41 = arith.constant dense<0.000000e+00> : vector<1xf32>
    %100 = vector.multi_reduction <add>, %99, %cst_41 [1] : vector<1x256xf32> to vector<1xf32>
    %101 = vector.shape_cast %100 : vector<1xf32> to vector<1x1xf32>
    %102 = arith.mulf %99, %98 : vector<1x256xf32>
    %cst_42 = arith.constant dense<0.000000e+00> : vector<1xf32>
    %103 = vector.multi_reduction <add>, %102, %cst_42 [1] : vector<1x256xf32> to vector<1xf32>
    %104 = vector.shape_cast %103 : vector<1xf32> to vector<1x1xf32>
    %cst_43 = arith.constant 3.906250e-03 : f32
    %105 = vector.broadcast %cst_43 : f32 to vector<1x1xf32>
    %106 = arith.mulf %101, %105 : vector<1x1xf32>
    %cst_44 = arith.constant 3.906250e-03 : f32
    %107 = vector.broadcast %cst_44 : f32 to vector<1x1xf32>
    %108 = arith.mulf %104, %107 : vector<1x1xf32>
    %109 = arith.mulf %106, %106 : vector<1x1xf32>
    %110 = arith.subf %108, %109 : vector<1x1xf32>
    %cst_45 = arith.constant 0.000000e+00 : f32
    %111 = vector.broadcast %cst_45 : f32 to vector<1x1xf32>
    %112 = arith.maximumf %110, %111 : vector<1x1xf32>
    %c0_46 = arith.constant 0 : index
    %c0_47 = arith.constant 0 : index
    %113 = vector.load %arg12[%c0_46, %c0_47] : memref<1x1xf32, #tpu.memory_space<vmem>>, vector<1x1xf32>
    %cst_48 = arith.constant 9.99999974E-6 : f32
    %114 = vector.broadcast %cst_48 : f32 to vector<1x1xf32>
    %115 = arith.addf %112, %114 : vector<1x1xf32>
    %116 = math.rsqrt %115 : vector<1x1xf32>
    %117 = arith.mulf %113, %116 : vector<1x1xf32>
    %c0_49 = arith.constant 0 : index
    %c0_50 = arith.constant 0 : index
    %118 = vector.load %arg13[%c0_49, %c0_50] : memref<1x1xf32, #tpu.memory_space<vmem>>, vector<1x1xf32>
    %119 = arith.mulf %106, %117 : vector<1x1xf32>
    %120 = arith.subf %118, %119 : vector<1x1xf32>
    %121 = vector.broadcast %117 : vector<1x1xf32> to vector<1x256xf32>
    %122 = arith.mulf %98, %121 : vector<1x256xf32>
    %123 = vector.broadcast %120 : vector<1x1xf32> to vector<1x256xf32>
    %124 = arith.addf %122, %123 : vector<1x256xf32>
    %cst_51 = arith.constant 0.000000e+00 : f32
    %125 = vector.broadcast %cst_51 : f32 to vector<1x256xf32>
    %126 = arith.maximumf %124, %125 : vector<1x256xf32>
    %c0_52 = arith.constant 0 : index
    %c0_53 = arith.constant 0 : index
    %127 = vector.load %arg14[%c0_52, %c0_53] : memref<1x256xf32, #tpu.memory_space<vmem>>, vector<1x256xf32>
    tpu.vector_store %arg14[%c0_52, %c0_53], %126 {strides = array<i32>} : memref<1x256xf32, #tpu.memory_space<vmem>>, vector<1x256xf32>,
    return
  }
  func.func @transform_0(%arg0: i32) -> (i32, i32) {
    %c0_i32 = arith.constant 0 : i32
    %c0_i32_0 = arith.constant 0 : i32
    %c0_i32_1 = arith.constant 0 : i32
    return %c0_i32, %c0_i32_0 : i32, i32
  }
  func.func @transform_1(%arg0: i32) -> (i32, i32) {
    %c0_i32 = arith.constant 0 : i32
    %c0_i32_0 = arith.constant 0 : i32
    %c0_i32_1 = arith.constant 0 : i32
    return %c0_i32, %c0_i32_0 : i32, i32
  }
  func.func @transform_2(%arg0: i32) -> (i32, i32) {
    %c0_i32 = arith.constant 0 : i32
    %c0_i32_0 = arith.constant 0 : i32
    %c0_i32_1 = arith.constant 0 : i32
    return %c0_i32, %c0_i32_0 : i32, i32
  }
  func.func @transform_3(%arg0: i32) -> (i32, i32) {
    %c0_i32 = arith.constant 0 : i32
    %c0_i32_0 = arith.constant 0 : i32
    %c0_i32_1 = arith.constant 0 : i32
    return %c0_i32, %c0_i32_0 : i32, i32
  }
  func.func @transform_4(%arg0: i32) -> (i32, i32) {
    %c0_i32 = arith.constant 0 : i32
    %c0_i32_0 = arith.constant 0 : i32
    %c0_i32_1 = arith.constant 0 : i32
    return %c0_i32, %c0_i32_0 : i32, i32
  }
  func.func @transform_5(%arg0: i32) -> (i32, i32) {
    %c0_i32 = arith.constant 0 : i32
    %c0_i32_0 = arith.constant 0 : i32
    %c0_i32_1 = arith.constant 0 : i32
    return %c0_i32, %c0_i32_0 : i32, i32
  }
  func.func @transform_6(%arg0: i32) -> (i32, i32) {
    %c0_i32 = arith.constant 0 : i32
    %c0_i32_0 = arith.constant 0 : i32
    %c0_i32_1 = arith.constant 0 : i32
    return %c0_i32, %c0_i32_0 : i32, i32
  }
  func.func @transform_7(%arg0: i32) -> (i32, i32) {
    %c0_i32 = arith.constant 0 : i32
    %c0_i32_0 = arith.constant 0 : i32
    %c0_i32_1 = arith.constant 0 : i32
    return %c0_i32, %c0_i32_0 : i32, i32
  }
  func.func @transform_8(%arg0: i32) -> (i32, i32) {
    %c0_i32 = arith.constant 0 : i32
    %c0_i32_0 = arith.constant 0 : i32
    %c0_i32_1 = arith.constant 0 : i32
    return %c0_i32, %c0_i32_0 : i32, i32
  }
  func.func @transform_9(%arg0: i32) -> (i32, i32) {
    %c0_i32 = arith.constant 0 : i32
    %c0_i32_0 = arith.constant 0 : i32
    %c0_i32_1 = arith.constant 0 : i32
    return %c0_i32, %c0_i32_0 : i32, i32
  }
  func.func @transform_10(%arg0: i32) -> (i32, i32) {
    %c0_i32 = arith.constant 0 : i32
    %c0_i32_0 = arith.constant 0 : i32
    %c0_i32_1 = arith.constant 0 : i32
    return %c0_i32, %c0_i32_0 : i32, i32
  }
  func.func @transform_11(%arg0: i32) -> (i32, i32) {
    %c0_i32 = arith.constant 0 : i32
    %c0_i32_0 = arith.constant 0 : i32
    %c0_i32_1 = arith.constant 0 : i32
    return %c0_i32, %c0_i32_0 : i32, i32
  }
  func.func @transform_12(%arg0: i32) -> (i32, i32) {
    %c0_i32 = arith.constant 0 : i32
    %c0_i32_0 = arith.constant 0 : i32
    %c0_i32_1 = arith.constant 0 : i32
    return %c0_i32, %c0_i32_0 : i32, i32
  }
  func.func @transform_13(%arg0: i32) -> (i32, i32) {
    %c0_i32 = arith.constant 0 : i32
    %c0_i32_0 = arith.constant 0 : i32
    %c0_i32_1 = arith.constant 0 : i32
    return %c0_i32, %c0_i32_0 : i32, i32
  }
}

</mosaic_0001>

<bundles_post_ra>
// kernel: tpu_custom_call.1
= control target key start
LH: loop header
LB: loop body
LE: loop exit
PB: predicated region body
PF: predicated region fallthrough
CT: control target
= control target key end

     0   :  { %s1576_s0 = inlined_call_operand.vmem [shape: f32[64,256], index: 0, kind: input, shape index: {}]   ;;  %s1577_s1 = inlined_call_operand.vmem [shape: f32[1,256], index: 1, kind: input, shape index: {}]   ;;  %s1578_s2 = inlined_call_operand.vmem [shape: f32[1,256], index: 2, kind: input, shape index: {}]   ;;  %s1579_s3 = inlined_call_operand.vmem [shape: f32[1,256], index: 3, kind: input, shape index: {}]   ;;  %s1580_s4 = inlined_call_operand.vmem [shape: f32[96,64], index: 4, kind: input, shape index: {}]   ;;  %s1581_s5 = inlined_call_operand.vmem [shape: f32[32,1], index: 5, kind: input, shape index: {}]   ;;  %s1582_s6 = inlined_call_operand.vmem [shape: f32[32,1], index: 6, kind: input, shape index: {}]   ;;  %s1583_s7 = inlined_call_operand.vmem [shape: f32[48,32], index: 7, kind: input, shape index: {}]   ;;  %s1584_s8 = inlined_call_operand.vmem [shape: f32[16,1], index: 8, kind: input, shape index: {}]   ;;  %s1585_s9 = inlined_call_operand.vmem [shape: f32[16,1], index: 9, kind: input, shape index: {}]   ;;  %s1586_s10 = inlined_call_operand.vmem [shape: f32[3,16], index: 10, kind: input, shape index: {}]   ;;  %s1587_s11 = inlined_call_operand.<no memory space> [shape: f32[1,1], index: 11, kind: input, shape index: {}]   ;;  %s1588_s13 = inlined_call_operand.hbm [shape: f32[1,256], index: 13, kind: output, shape index: {}]   ;;  %s1589_s12 = inlined_call_operand.<no memory space> [shape: f32[1,1], index: 12, kind: input, shape index: {}]  }
   0x1   :  { %v18_v0 = vstv %s1587_s11  ;;  %v20_v1 = vstv %s1589_s12 }
   0x2   :  { %19 = vst [vmem:[#allocation2] sm:$0x1] %v18_v0  ;;  %21 = vst [vmem:[#allocation3] sm:$0x1] %v20_v1 }
   0x3   :  { %v50_v2 = vld [vmem:[%s1576_s0 + $0x8] sm:$0xff]  ;;  %v52_v3 = vld [vmem:[%s1576_s0 + $0x18] sm:$0xff]  ;;  %v49_v4 = vld [vmem:[%s1576_s0] sm:$0xff]  ;;  %v1060_v9 = vmov 0.0  }
   0x4   :  { %v978_v5 = vpack.c.bf16 %v52_v3, %v50_v2  ;;  %v51_v6 = vld [vmem:[%s1576_s0 + $0x10] sm:$0xff]  ;;  %v54_v7 = vld [vmem:[%s1576_s0 + $0x28] sm:$0xff]  ;;  %v56_v8 = vld [vmem:[%s1576_s0 + $0x38] sm:$0xff]  ;;  %181 = vmatprep.mubr.f32.mxu0 %v1060_v9  ;;  %241 = vmatprep.mubr.f32.mxu1 %v1060_v9 }
   0x5   :  { %v980_v10 = vpack.c.bf16 %v51_v6, %v49_v4  ;;  %v982_v11 = vpack.c.bf16 %v56_v8, %v54_v7  ;;  %v53_v12 = vld [vmem:[%s1576_s0 + $0x20] sm:$0xff]  ;;  %v55_v13 = vld [vmem:[%s1576_s0 + $0x30] sm:$0xff]  ;;  %v58_v14 = vld [vmem:[%s1576_s0 + $0x48] sm:$0xff] }
   0x6   :  { %979 = vmatprep.subr.bf16.mxu0 %v978_v5  ;;  %1006 = vmatprep.subr.bf16.mxu1 %v978_v5  ;;  %v60_v15 = vld [vmem:[%s1576_s0 + $0x58] sm:$0xff]  ;;  %v984_v16 = vpack.c.bf16 %v55_v13, %v53_v12  ;;  %v57_v18 = vld [vmem:[%s1576_s0 + $0x40] sm:$0xff]  ;;  %v59_v19 = vld [vmem:[%s1576_s0 + $0x50] sm:$0xff] }
   0x7   :  { %981 = vmatpush1.bf16.msra.mxu0 %v980_v10  ;;  %1010 = vmatpush1.bf16.msra.mxu1 %v980_v10  ;;  %v986_v17 = vpack.c.bf16 %v60_v15, %v58_v14  ;;  %v62_v20 = vld [vmem:[%s1576_s0 + $0x68] sm:$0xff]  ;;  %v64_v21 = vld [vmem:[%s1576_s0 + $0x78] sm:$0xff]  ;;  %v988_v22 = vpack.c.bf16 %v59_v19, %v57_v18  ;;  %v61_v24 = vld [vmem:[%s1576_s0 + $0x60] sm:$0xff] }
   0x8   :  { %983 = vmatprep.subr.bf16.mxu0 %v982_v11  ;;  %1007 = vmatprep.subr.bf16.mxu1 %v982_v11  ;;  %v990_v23 = vpack.c.bf16 %v64_v21, %v62_v20  ;;  %v63_v25 = vld [vmem:[%s1576_s0 + $0x70] sm:$0xff] }
   0xb   :  { %985 = vmatpush1.bf16.msra.mxu0 %v984_v16  ;;  %1011 = vmatpush1.bf16.msra.mxu1 %v984_v16 }
   0xc   :  { %987 = vmatprep.subr.bf16.mxu0 %v986_v17  ;;  %1008 = vmatprep.subr.bf16.mxu1 %v986_v17 }
   0xd   :  { %22 = vsyncpa [#allocation5], 0  ;;  %v992_v26 = vpack.c.bf16 %v63_v25, %v61_v24  ;;  %v68_v27 = vld [vmem:[%s1580_s4] sm:$0xff]  ;;  %vm80_vm0 = vcmask 523264   ;;  %v78_v28 = vld [vmem:[%s1580_s4 + $0x50] sm:$0xff]  ;;  %s1061_s0 = smov 1   ;;  %v270_v4 = vlaneseq }
   0xe   :  { %v69_v29 = vld [vmem:[%s1580_s4 + $0x8] sm:$0xff]  ;;  %v79_v30 = vld [vmem:[%s1580_s4 + $0x58] sm:$0xff]  ;;  %v70_v31 = vld [vmem:[%s1580_s4 + $0x10] sm:$0xff]  ;;  %s1062_s27 = smov 127   ;;  %vm529_vm3 = vcmask 261120   ;;  %vm766_vm4 = vcmask 130048  }
   0xf   :  { %989 = vmatpush1.bf16.msra.mxu0 %v988_v22  ;;  %1012 = vmatpush1.bf16.msra.mxu1 %v988_v22  ;;  %v71_v32 = vld [vmem:[%s1580_s4 + $0x18] sm:$0xff]  ;;  %v72_v33 = vld [vmem:[%s1580_s4 + $0x20] sm:$0xff]  ;;  %v73_v34 = vld [vmem:[%s1580_s4 + $0x28] sm:$0xff]  ;;  %v1286_v6 = vshrl.u32 %v270_v4, 7  ;;  %v1289_v8 = vand.u32 127, %v270_v4  ;;  %vm873_vm5 = vcmask 1040384  }
  0x10   :  { %991 = vmatprep.subr.bf16.mxu0 %v990_v23  ;;  %1009 = vmatprep.subr.bf16.mxu1 %v990_v23  ;;  %v74_v35 = vld [vmem:[%s1580_s4 + $0x30] sm:$0xff]  ;;  %v75_v36 = vld [vmem:[%s1580_s4 + $0x38] sm:$0xff]  ;;  %v76_v37 = vld [vmem:[%s1580_s4 + $0x40] sm:$0xff]  ;;  %vm942_vm6 = vcmp.lt.s32.totalorder %v270_v4, 256 }
  0x11   :  { %v77_v38 = vld [vmem:[%s1580_s4 + $0x48] sm:$0xff]  ;;  %v1292_v10 = vsub.s32 0, %v1286_v6  ;;  %v288_v11 = vsub.s32 1, %v1286_v6  ;;  %v65_v13 = vld [vmem:[%s1577_s1] sm:$0x3]  ;;  %vm272_vm1 = vcmp.lt.s32.totalorder %v1289_v8, 1 }
  0x12   :  { %v66_v19 = vld [vmem:[%s1578_s2] sm:$0x3]  ;;  %vm324_vm2 = vcmp.lt.s32.totalorder %v1289_v8, 127 }
  0x13   :  { %993 = vmatpush1.bf16.msra.mxu0 %v992_v26  ;;  %1013 = vmatpush1.bf16.msra.mxu1 %v992_v26  ;;  %v1300_v15 = vrot.slane %v65_v13, %v1292_v10  ;;  %v1302_v16 = vrot.slane %v65_v13, %v288_v11 }
  0x16   :  { %959 = vmatmul.mubr.msk.f32.vlgmr.msra.gmra.mrb[0].mxu0 %vm80_vm0, %v68_v27  ;;  %969 = vmatmul.mubr.msk.f32.vlgmr.msra.gmra.mrb[0].mxu1 %vm80_vm0, %v78_v28  ;;  %v1323_v28 = vrot.slane %v66_v19, %v1292_v10 }
  0x17   :  { %187 = vmatprep.mubr.f32.mxu0 %v1060_v9  ;;  %247 = vmatprep.mubr.f32.mxu1 %v1060_v9 }
  0x1a   :  { %960 = vmatmul.mubr.msk.f32.gmra.mrb[2].mxu0 %vm80_vm0, %v69_v29  ;;  %970 = vmatmul.mubr.msk.f32.gmra.mrb[2].mxu1 %vm80_vm0, %v79_v30  ;;  %v1325_v29 = vrot.slane %v66_v19, %v288_v11  ;;  %v67_v30 = vld [vmem:[%s1579_s3] sm:$0x3] }
  0x1b   :  { %193 = vmatprep.mubr.f32.mxu0 %v1060_v9  ;;  %612 = vmatprep.mubr.f32.mxu1 %v1060_v9 }
  0x1e   :  { %961 = vmatmul.mubr.msk.f32.gmra.mrb[4].mxu0 %vm80_vm0, %v70_v31 }
  0x1f   :  { %199 = vmatprep.mubr.f32.mxu0 %v1060_v9 }
  0x22   :  { %962 = vmatmul.mubr.msk.f32.gmra.mrb[6].mxu0 %vm80_vm0, %v71_v32 }
  0x23   :  { %205 = vmatprep.mubr.f32.mxu0 %v1060_v9 }
  0x26   :  { %963 = vmatmul.mubr.msk.f32.gmra.mrb[8].mxu0 %vm80_vm0, %v72_v33 }
  0x27   :  { %211 = vmatprep.mubr.f32.mxu0 %v1060_v9 }
  0x2a   :  { %964 = vmatmul.mubr.msk.f32.gmra.mrb[10].mxu0 %vm80_vm0, %v73_v34 }
  0x2b   :  { %217 = vmatprep.mubr.f32.mxu0 %v1060_v9 }
  0x2e   :  { %965 = vmatmul.mubr.msk.f32.gmra.mrb[12].mxu0 %vm80_vm0, %v74_v35 }
  0x2f   :  { %223 = vmatprep.mubr.f32.mxu0 %v1060_v9 }
  0x32   :  { %966 = vmatmul.mubr.msk.f32.gmra.mrb[14].mxu0 %vm80_vm0, %v75_v36 }
  0x33   :  { %229 = vmatprep.mubr.f32.mxu0 %v1060_v9 }
  0x36   :  { %967 = vmatmul.mubr.msk.f32.gmra.mrb[16].mxu0 %vm80_vm0, %v76_v37 }
  0x37   :  { %235 = vmatprep.mubr.f32.mxu0 %v1060_v9 }
  0x3a   :  { %968 = vmatmul.mubr.msk.f32.gmra.mrb[18].mxu0 %vm80_vm0, %v77_v38 }
  0xe9   :  { %v183_v39 = vpop.f32.mrb[0].mxu0  ;;  %v243_v40 = vpop.f32.mrb[0].mxu1 }
  0xea   :  { %254 = vrot.lane.b32.xlu0 %v183_v39, %s1061_s0  ;;  %v185_v41 = vpop.f32.mrb[1].mxu0  ;;  %v245_v42 = vpop.f32.mrb[1].mxu1 }
  0xeb   :  { %262 = vrot.lane.b32.xlu1 %v185_v41, %s1061_s0  ;;  %v1343_v41 = vrot.slane %v67_v30, %v1292_v10 }
  0xed   :  { %v189_v43 = vpop.f32.mrb[2].mxu0  ;;  %v249_v44 = vpop.f32.mrb[2].mxu1 }
  0xee   :  { %312 = vrot.lane.b32.xlu0 %v243_v40, %s1062_s27  ;;  %v191_v45 = vpop.f32.mrb[3].mxu0  ;;  %v251_v46 = vpop.f32.mrb[3].mxu1 }
  0xef   :  { %314 = vrot.lane.b32.xlu1 %v249_v44, %s1062_s27 }
  0xf1   :  { %v195_v47 = vpop.f32.mrb[4].mxu0 }
  0xf2   :  { %256 = vrot.lane.b32.xlu0 %v189_v43, %s1061_s0  ;;  %v197_v48 = vpop.f32.mrb[5].mxu0 }
  0xf3   :  { %264 = vrot.lane.b32.xlu1 %v191_v45, %s1061_s0 }
  0xf5   :  { %v201_v49 = vpop.f32.mrb[6].mxu0 }
  0xf6   :  { %258 = vrot.lane.b32.xlu0 %v195_v47, %s1061_s0  ;;  %v203_v50 = vpop.f32.mrb[7].mxu0 }
  0xf7   :  { %260 = vrot.lane.b32.xlu1 %v201_v49, %s1061_s0 }
  0xf9   :  { %v1259_v51 = vpop.f32.mrb[8].mxu0 }
  0xfa   :  { %266 = vrot.lane.b32.xlu0 %v197_v48, %s1061_s0  ;;  %v1262_v52 = vpop.f32.mrb[9].mxu0 }
  0xfb   :  { %268 = vrot.lane.b32.xlu1 %v203_v50, %s1061_s0 }
  0xfd   :  { %v1265_v53 = vpop.f32.mrb[10].mxu0 }
  0xfe   :  { %v1267_v54 = vpop.f32.mrb[11].mxu0 }
 0x101   :  { %v1269_v55 = vpop.f32.mrb[12].mxu0 }
 0x102   :  { %v1271_v56 = vpop.f32.mrb[13].mxu0 }
 0x105   :  { %v1273_v57 = vpop.f32.mrb[14].mxu0 }
 0x106   :  { %v1275_v58 = vpop.f32.mrb[15].mxu0 }
 0x109   :  { %v231_v59 = vpop.f32.mrb[16].mxu0 }
 0x10a   :  { %308 = vrot.lane.b32.xlu0 %v231_v59, %s1062_s27  ;;  %v233_v60 = vpop.f32.mrb[17].mxu0 }
 0x10d   :  { %v237_v61 = vpop.f32.mrb[18].mxu0 }
 0x10e   :  { %316 = vrot.lane.b32.xlu0 %v233_v60, %s1062_s27  ;;  %310 = vrot.lane.b32.xlu1 %v237_v61, %s1062_s27  ;;  %v239_v62 = vpop.f32.mrb[19].mxu0 }
 0x112   :  { %320 = vrot.lane.b32.xlu0 %v245_v42, %s1062_s27  ;;  %318 = vrot.lane.b32.xlu1 %v239_v62, %s1062_s27  ;;  %v1345_v42 = vrot.slane %v67_v30, %v288_v11 }
 0x116   :  { %322 = vrot.lane.b32.xlu1 %v251_v46, %s1062_s27 }
 0x15c   :  { %v255_v63 = vpop.permute.xlu0 %254 }
 0x15d   :  { %v263_v0 = vpop.permute.xlu1 %262 }
 0x15e   :  { %v273_v17 = vsel %vm272_vm1, %v255_v63, %v263_v0  ;;  %v277_v18 = vsel %vm272_vm1, %v263_v0, %v255_v63 }
 0x15f   :  { %v292_v26 = vmul.f32 %v1300_v15, %v277_v18  ;;  %v293_v27 = vmul.f32 %v1302_v16, %v273_v17 }
 0x160   :  { %v313_v1 = vpop.permute.xlu0 %312 }
 0x161   :  { %v1283_v2 = vpop.permute.xlu1 %314  ;;  %v300_v43 = vadd.f32 %v292_v26, %v1259_v51  ;;  %v301_v44 = vadd.f32 %v293_v27, %v1262_v52 }
 0x164   :  { %v257_v3 = vpop.permute.xlu0 %256 }
 0x165   :  { %v265_v5 = vpop.permute.xlu1 %264 }
 0x166   :  { %v274_v20 = vsel %vm272_vm1, %v257_v3, %v265_v5  ;;  %v278_v21 = vsel %vm272_vm1, %v265_v5, %v257_v3 }
 0x167   :  { %v294_v31 = vmul.f32 %v1300_v15, %v278_v21  ;;  %v295_v32 = vmul.f32 %v1302_v16, %v274_v20 }
 0x168   :  { %v259_v7 = vpop.permute.xlu0 %258 }
 0x169   :  { %v261_v12 = vpop.permute.xlu1 %260  ;;  %v302_v47 = vadd.f32 %v294_v31, %v1265_v53  ;;  %v303_v48 = vadd.f32 %v295_v32, %v1267_v54 }
 0x16c   :  { %v267_v14 = vpop.permute.xlu0 %266 }
 0x16d   :  { %v269_v22 = vpop.permute.xlu1 %268  ;;  %v275_v24 = vsel %vm272_vm1, %v259_v7, %v267_v14  ;;  %v279_v25 = vsel %vm272_vm1, %v267_v14, %v259_v7 }
 0x16e   :  { %v296_v33 = vmul.f32 %v1300_v15, %v279_v25  ;;  %v297_v34 = vmul.f32 %v1302_v16, %v275_v24  ;;  %v276_v35 = vsel %vm272_vm1, %v261_v12, %v269_v22  ;;  %v280_v36 = vsel %vm272_vm1, %v269_v22, %v261_v12 }
 0x16f   :  { %v298_v49 = vmul.f32 %v1300_v15, %v280_v36  ;;  %v299_v50 = vmul.f32 %v1302_v16, %v276_v35 }
 0x170   :  { %v304_v59 = vadd.f32 %v296_v33, %v1269_v55  ;;  %v305_v60 = vadd.f32 %v297_v34, %v1271_v56 }
 0x171   :  { %v306_v7 = vadd.f32 %v298_v49, %v1273_v57  ;;  %v307_v11 = vadd.f32 %v299_v50, %v1275_v58  ;;  %v1063_v49 = vmov 0  }
 0x172   :  { %1020 = vset.pattern.permute.xlu1 %v1063_v49  ;;  %1021 = vset.pattern.permute.xlu0 %v1063_v49 }
 0x17c   :  { %v309_v23 = vpop.permute.xlu0 %308 }
 0x180   :  { %v317_v37 = vpop.permute.xlu0 %316  ;;  %v311_v38 = vpop.permute.xlu1 %310 }
 0x181   :  { %v325_v39 = vsel %vm324_vm2, %v309_v23, %v317_v37  ;;  %v329_v40 = vsel %vm324_vm2, %v317_v37, %v309_v23 }
 0x182   :  { %v344_v45 = vmul.f32 %v1323_v28, %v325_v39  ;;  %v345_v46 = vmul.f32 %v1325_v29, %v329_v40 }
 0x184   :  { %v1357_v61 = vadd.f32 %v344_v45, %v300_v43  ;;  %v1359_v51 = vadd.f32 %v345_v46, %v301_v44  ;;  %v321_v52 = vpop.permute.xlu0 %320  ;;  %v319_v62 = vpop.permute.xlu1 %318 }
 0x185   :  { %v327_v63 = vsel %vm324_vm2, %v313_v1, %v321_v52  ;;  %v331_v53 = vsel %vm324_vm2, %v321_v52, %v313_v1  ;;  %v326_v54 = vsel %vm324_vm2, %v311_v38, %v319_v62  ;;  %v330_v55 = vsel %vm324_vm2, %v319_v62, %v311_v38 }
 0x186   :  { %v348_v56 = vmul.f32 %v1323_v28, %v327_v63  ;;  %v349_v0 = vmul.f32 %v1325_v29, %v331_v53  ;;  %v346_v3 = vmul.f32 %v1323_v28, %v326_v54  ;;  %v347_v5 = vmul.f32 %v1325_v29, %v330_v55 }
 0x187   :  { %v371_v1 = vmul.f32 %v1343_v41, %v1357_v61  ;;  %v372_v12 = vmul.f32 %v1345_v42, %v1359_v51 }
 0x188   :  { %v1379_v13 = vadd.f32 %v348_v56, %v304_v59  ;;  %v1381_v14 = vadd.f32 %v349_v0, %v305_v60  ;;  %v1383_v17 = vadd.f32 %v346_v3, %v302_v47  ;;  %v1385_v18 = vadd.f32 %v347_v5, %v303_v48  ;;  %v323_v19 = vpop.permute.xlu1 %322 }
 0x189   :  { %v328_v57 = vsel %vm324_vm2, %v1283_v2, %v323_v19  ;;  %v332_v58 = vsel %vm324_vm2, %v323_v19, %v1283_v2  ;;  %v379_v20 = vadd.f32 %v372_v12, %v371_v1  ;;  %v391_v21 = vmul.f32 %v371_v1, %v1357_v61 }
 0x18a   :  { %v350_v22 = vmul.f32 %v1323_v28, %v328_v57  ;;  %v351_v23 = vmul.f32 %v1325_v29, %v332_v58  ;;  %v392_v24 = vmul.f32 %v372_v12, %v1359_v51  ;;  %v373_v25 = vmul.f32 %v1343_v41, %v1383_v17 }
 0x18b   :  { %380 = vadd.xlane.f32.xlu0 %v379_v20  ;;  %v374_v26 = vmul.f32 %v1345_v42, %v1385_v18  ;;  %v375_v32 = vmul.f32 %v1343_v41, %v1379_v13  ;;  %v376_v33 = vmul.f32 %v1345_v42, %v1381_v14 }
 0x18c   :  { %v1401_v27 = vadd.f32 %v350_v22, %v306_v7  ;;  %v1403_v30 = vadd.f32 %v351_v23, %v307_v11  ;;  %v399_v2 = vadd.f32 %v392_v24, %v391_v21  ;;  %v393_v37 = vmul.f32 %v373_v25, %v1383_v17 }
 0x18d   :  { %v382_v31 = vadd.f32 %v374_v26, %v373_v25  ;;  %v385_v38 = vadd.f32 %v376_v33, %v375_v32  ;;  %v395_v39 = vmul.f32 %v375_v32, %v1379_v13  ;;  %v396_v40 = vmul.f32 %v376_v33, %v1381_v14 }
 0x18e   :  { %v377_v34 = vmul.f32 %v1343_v41, %v1401_v27  ;;  %v378_v35 = vmul.f32 %v1345_v42, %v1403_v30  ;;  %v394_v43 = vmul.f32 %v374_v26, %v1385_v18 }
 0x18f   :  { %400 = vadd.xlane.f32.xlu0 %v399_v2  ;;  %383 = vadd.xlane.f32.xlu1 %v382_v31  ;;  %v405_v44 = vadd.f32 %v396_v40, %v395_v39  ;;  %v433_v39 = vld [vmem:[%s1581_s5 + $0x10] sm:$0xff] }
 0x190   :  { %v388_v36 = vadd.f32 %v378_v35, %v377_v34  ;;  %v402_v45 = vadd.f32 %v394_v43, %v393_v37  ;;  %v397_v46 = vmul.f32 %v377_v34, %v1401_v27  ;;  %v398_v47 = vmul.f32 %v378_v35, %v1403_v30  ;;  %v431_v34 = vld [vmem:[%s1581_s5] sm:$0xff] }
 0x192   :  { %v408_v48 = vadd.f32 %v398_v47, %v397_v46  ;;  %v434_v46 = vld [vmem:[%s1581_s5 + $0x18] sm:$0xff] }
 0x193   :  { %386 = vadd.xlane.f32.xlu1 %v385_v38  ;;  %389 = vadd.xlane.f32.xlu0 %v388_v36  ;;  %v432_v38 = vld [vmem:[%s1581_s5 + $0x8] sm:$0xff] }
 0x197   :  { %406 = vadd.xlane.f32.xlu1 %v405_v44  ;;  %403 = vadd.xlane.f32.xlu0 %v402_v45 }
 0x19b   :  { %409 = vadd.xlane.f32.xlu0 %v408_v48 }
 0x218   :  { %v381_v50 = vpop.xlane.xlu0 %380 }
 0x219   :  { %v411_v59 = vmul.f32 0.00390625, %v381_v50  ;;  %v449_v50 = vld [vmem:[%s1582_s6 + $0x10] sm:$0xff] }
 0x21b   :  { %v419_v62 = vmul.f32 %v411_v59, %v411_v59 }
 0x21c   :  { %v401_v60 = vpop.xlane.xlu0 %400  ;;  %v384_v52 = vpop.xlane.xlu1 %383 }
 0x21d   :  { %v415_v63 = vmul.f32 0.00390625, %v401_v60  ;;  %v412_v54 = vmul.f32 0.00390625, %v384_v52 }
 0x21f   :  { %v423_v53 = vsub.f32 %v415_v63, %v419_v62  ;;  %v420_v7 = vmul.f32 %v412_v54, %v412_v54  ;;  %v447_v62 = vld [vmem:[%s1582_s6] sm:$0xff] }
 0x220   :  { %v390_v55 = vpop.xlane.xlu0 %389  ;;  %v387_v56 = vpop.xlane.xlu1 %386 }
 0x221   :  { %v427_v0 = vmax.f32 %v423_v53, 0.0  ;;  %v413_v3 = vmul.f32 0.00390625, %v387_v56  ;;  %v414_v11 = vmul.f32 0.00390625, %v390_v55  ;;  %v448_v55 = vld [vmem:[%s1582_s6 + $0x8] sm:$0xff] }
 0x223   :  { %v435_v5 = vadd.f32 1e-05, %v427_v0  ;;  %v421_v19 = vmul.f32 %v413_v3, %v413_v3  ;;  %v422_v23 = vmul.f32 %v414_v11, %v414_v11 }
 0x224   :  { %v404_v1 = vpop.xlane.xlu0 %403  ;;  %v407_v12 = vpop.xlane.xlu1 %406 }
 0x225   :  { %1022 = vrsqrt.f32 %v435_v5  ;;  %v416_v57 = vmul.f32 0.00390625, %v404_v1  ;;  %v417_v58 = vmul.f32 0.00390625, %v407_v12 }
 0x227   :  { %v424_v20 = vsub.f32 %v416_v57, %v420_v7  ;;  %v425_v21 = vsub.f32 %v417_v58, %v421_v19 }
 0x228   :  { %v410_v22 = vpop.xlane.xlu0 %409 }
 0x229   :  { %v428_v24 = vmax.f32 %v424_v20, 0.0  ;;  %v429_v25 = vmax.f32 %v425_v21, 0.0  ;;  %v418_v26 = vmul.f32 0.00390625, %v410_v22 }
 0x22b   :  { %v436_v2 = vadd.f32 1e-05, %v428_v24  ;;  %v437_v31 = vadd.f32 1e-05, %v429_v25  ;;  %v426_v32 = vsub.f32 %v418_v26, %v422_v23 }
 0x22d   :  { %1024 = vrsqrt.f32 %v436_v2  ;;  %v430_v33 = vmax.f32 %v426_v32, 0.0 }
 0x22e   :  { %1026 = vrsqrt.f32 %v437_v31 }
 0x22f   :  { %v1023_v35 = vpop.eup %1022  ;;  %v438_v36 = vadd.f32 1e-05, %v430_v33 }
 0x230   :  { %v443_v37 = vmul.f32 %v1023_v35, %v431_v34 }
 0x231   :  { %1028 = vrsqrt.f32 %v438_v36 }
 0x232   :  { %461 = vperm.xlu1 %1020, %v443_v37   ;;  %v451_v52 = vmul.f32 %v443_v37, %v411_v59 }
 0x234   :  { %v455_v63 = vsub.f32 %v447_v62, %v451_v52 }
 0x237   :  { %v1025_v40 = vpop.eup %1024 }
 0x238   :  { %v1027_v43 = vpop.eup %1026  ;;  %v444_v44 = vmul.f32 %v1025_v40, %v432_v38 }
 0x239   :  { %v445_v45 = vmul.f32 %v1027_v43, %v433_v39 }
 0x23a   :  { %466 = vperm.xlu0 %1021, %v444_v44   ;;  %v452_v53 = vmul.f32 %v444_v44, %v412_v54 }
 0x23b   :  { %v1029_v47 = vpop.eup %1028  ;;  %471 = vperm.xlu1 %1020, %v445_v45   ;;  %v453_v49 = vmul.f32 %v445_v45, %v413_v3  ;;  %v450_v3 = vld [vmem:[%s1582_s6 + $0x18] sm:$0xff]  ;;  %v524_v45 = vld [vmem:[%s1583_s7 + $0x8] sm:$0xff] }
 0x23c   :  { %v446_v48 = vmul.f32 %v1029_v47, %v434_v46  ;;  %v456_v56 = vsub.f32 %v448_v55, %v452_v53  ;;  %v525_v46 = vld [vmem:[%s1583_s7 + $0x10] sm:$0xff]  ;;  %v526_v47 = vld [vmem:[%s1583_s7 + $0x18] sm:$0xff] }
 0x23d   :  { %v457_v60 = vsub.f32 %v449_v50, %v453_v49  ;;  %v528_v49 = vld [vmem:[%s1583_s7 + $0x28] sm:$0xff] }
 0x23e   :  { %v454_v0 = vmul.f32 %v446_v48, %v414_v11 }
 0x23f   :  { %476 = vperm.xlu1 %1020, %v446_v48   ;;  %v527_v48 = vld [vmem:[%s1583_s7 + $0x20] sm:$0xff] }
 0x240   :  { %v458_v59 = vsub.f32 %v450_v3, %v454_v0 }
 0x243   :  { %499 = vperm.xlu1 %1020, %v457_v60  }
 0x247   :  { %489 = vperm.xlu1 %1020, %v455_v63  }
 0x24b   :  { %494 = vperm.xlu1 %1020, %v456_v56  }
 0x24f   :  { %504 = vperm.xlu1 %1020, %v458_v59  }
 0x2b1   :  { %v462_v5 = vpop.permute.xlu1 %461 }
 0x2b2   :  { %v479_v57 = vmul.f32 %v462_v5, %v1357_v61  ;;  %v480_v58 = vmul.f32 %v462_v5, %v1359_v51 }
 0x2b9   :  { %v467_v19 = vpop.permute.xlu0 %466 }
 0x2ba   :  { %v472_v7 = vpop.permute.xlu1 %471  ;;  %v481_v20 = vmul.f32 %v467_v19, %v1383_v17  ;;  %v482_v11 = vmul.f32 %v467_v19, %v1385_v18 }
 0x2bb   :  { %v483_v23 = vmul.f32 %v472_v7, %v1379_v13  ;;  %v484_v24 = vmul.f32 %v472_v7, %v1381_v14 }
 0x2be   :  { %v477_v1 = vpop.permute.xlu1 %476 }
 0x2bf   :  { %v485_v31 = vmul.f32 %v477_v1, %v1401_v27  ;;  %v486_v32 = vmul.f32 %v477_v1, %v1403_v30  ;;  %v523_v30 = vld [vmem:[%s1583_s7] sm:$0xff] }
 0x2c2   :  { %v500_v12 = vpop.permute.xlu1 %499 }
 0x2c3   :  { %v511_v61 = vadd.f32 %v500_v12, %v483_v23  ;;  %v512_v33 = vadd.f32 %v500_v12, %v484_v24 }
 0x2c5   :  { %v519_v39 = vmax.f32 %v511_v61, 0.0  ;;  %v520_v14 = vmax.f32 %v512_v33, 0.0 }
 0x2c6   :  { %v490_v54 = vpop.permute.xlu1 %489 }
 0x2c7   :  { %v507_v21 = vadd.f32 %v490_v54, %v479_v57  ;;  %v508_v22 = vadd.f32 %v490_v54, %v480_v58 }
 0x2c9   :  { %v515_v51 = vmax.f32 %v507_v21, 0.0  ;;  %v516_v34 = vmax.f32 %v508_v22, 0.0 }
 0x2ca   :  { %v495_v25 = vpop.permute.xlu1 %494 }
 0x2cb   :  { %v509_v26 = vadd.f32 %v495_v25, %v481_v20  ;;  %v510_v2 = vadd.f32 %v495_v25, %v482_v11 }
 0x2cd   :  { %v517_v17 = vmax.f32 %v509_v26, 0.0  ;;  %v518_v35 = vmax.f32 %v510_v2, 0.0 }
 0x2ce   :  { %v505_v18 = vpop.permute.xlu1 %504 }
 0x2cf   :  { %v996_v36 = vpack.c.bf16 %v517_v17, %v515_v51  ;;  %v513_v37 = vadd.f32 %v505_v18, %v485_v31  ;;  %v514_v38 = vadd.f32 %v505_v18, %v486_v32  ;;  %v994_v13 = vpack.c.bf16 %v518_v35, %v516_v34 }
 0x2d1   :  { %v521_v40 = vmax.f32 %v513_v37, 0.0  ;;  %v522_v43 = vmax.f32 %v514_v38, 0.0  ;;  %995 = vmatprep.subr.bf16.mxu1 %v994_v13 }
 0x2d2   :  { %997 = vmatpush1.bf16.msra.mxu1 %v996_v36 }
 0x2d3   :  { %v1000_v27 = vpack.c.bf16 %v521_v40, %v519_v39  ;;  %v998_v44 = vpack.c.bf16 %v522_v43, %v520_v14 }
 0x2d5   :  { %999 = vmatprep.subr.bf16.mxu1 %v998_v44 }
 0x2d6   :  { %1001 = vmatpush1.bf16.msra.mxu1 %v1000_v27 }
 0x2d9   :  { %971 = vmatmul.mubr.msk.f32.vlgmr.msra.gmra.mrb[4].mxu1 %vm529_vm3, %v523_v30 }
 0x2da   :  { %618 = vmatprep.mubr.f32.mxu1 %v1060_v9 }
 0x2dd   :  { %972 = vmatmul.mubr.msk.f32.gmra.mrb[6].mxu1 %vm529_vm3, %v524_v45 }
 0x2de   :  { %624 = vmatprep.mubr.f32.mxu1 %v1060_v9 }
 0x2e1   :  { %973 = vmatmul.mubr.msk.f32.gmra.mrb[8].mxu1 %vm529_vm3, %v525_v46 }
 0x2e2   :  { %630 = vmatprep.mubr.f32.mxu1 %v1060_v9 }
 0x2e5   :  { %974 = vmatmul.mubr.msk.f32.gmra.mrb[10].mxu1 %vm529_vm3, %v526_v47 }
 0x2e6   :  { %636 = vmatprep.mubr.f32.mxu1 %v1060_v9 }
 0x2e9   :  { %975 = vmatmul.mubr.msk.f32.gmra.mrb[12].mxu1 %vm529_vm3, %v527_v48 }
 0x2ea   :  { %642 = vmatprep.mubr.f32.mxu1 %v1060_v9 }
 0x2ed   :  { %976 = vmatmul.mubr.msk.f32.gmra.mrb[14].mxu1 %vm529_vm3, %v528_v49 }
 0x2ee   :  { %834 = vmatprep.mubr.f32.mxu1 %v1060_v9 }
 0x3ac   :  { %v614_v50 = vpop.f32.mrb[4].mxu1 }
 0x3ad   :  { %649 = vrot.lane.b32.xlu1 %v614_v50, %s1061_s0  ;;  %v616_v60 = vpop.f32.mrb[5].mxu1 }
 0x3ae   :  { %653 = vrot.lane.b32.xlu0 %v616_v60, %s1061_s0 }
 0x3b0   :  { %v620_v52 = vpop.f32.mrb[6].mxu1 }
 0x3b1   :  { %651 = vrot.lane.b32.xlu1 %v620_v52, %s1061_s0  ;;  %v622_v62 = vpop.f32.mrb[7].mxu1 }
 0x3b4   :  { %v626_v63 = vpop.f32.mrb[8].mxu1 }
 0x3b5   :  { %655 = vrot.lane.b32.xlu1 %v622_v62, %s1061_s0  ;;  %v628_v53 = vpop.f32.mrb[9].mxu1 }
 0x3b8   :  { %v632_v55 = vpop.f32.mrb[10].mxu1 }
 0x3b9   :  { %v634_v56 = vpop.f32.mrb[11].mxu1 }
 0x3bc   :  { %v638_v0 = vpop.f32.mrb[12].mxu1 }
 0x3bd   :  { %669 = vrot.lane.b32.xlu0 %v638_v0, %s1062_s27  ;;  %v640_v9 = vpop.f32.mrb[13].mxu1 }
 0x3c0   :  { %v644_v3 = vpop.f32.mrb[14].mxu1 }
 0x3c1   :  { %673 = vrot.lane.b32.xlu0 %v640_v9, %s1062_s27  ;;  %671 = vrot.lane.b32.xlu1 %v644_v3, %s1062_s27  ;;  %v646_v59 = vpop.f32.mrb[15].mxu1 }
 0x3c5   :  { %675 = vrot.lane.b32.xlu1 %v646_v59, %s1062_s27 }
 0x41f   :  { %v650_v5 = vpop.permute.xlu1 %649 }
 0x420   :  { %v654_v1 = vpop.permute.xlu0 %653 }
 0x421   :  { %v657_v12 = vsel %vm272_vm1, %v650_v5, %v654_v1  ;;  %v659_v19 = vsel %vm272_vm1, %v654_v1, %v650_v5 }
 0x422   :  { %v661_v58 = vmul.f32 %v659_v19, %v1300_v15  ;;  %v662_v20 = vmul.f32 %v657_v12, %v1302_v16 }
 0x423   :  { %v652_v7 = vpop.permute.xlu1 %651 }
 0x424   :  { %v665_v31 = vadd.f32 %v661_v58, %v626_v63  ;;  %v666_v32 = vadd.f32 %v662_v20, %v628_v53 }
 0x427   :  { %v656_v54 = vpop.permute.xlu1 %655 }
 0x428   :  { %v658_v11 = vsel %vm272_vm1, %v652_v7, %v656_v54  ;;  %v660_v21 = vsel %vm272_vm1, %v656_v54, %v652_v7 }
 0x429   :  { %v663_v24 = vmul.f32 %v660_v21, %v1300_v15  ;;  %v664_v25 = vmul.f32 %v658_v11, %v1302_v16  ;;  %v727_v11 = vld [vmem:[%s1585_s9] sm:$0xff]  ;;  %v720_v21 = vld [vmem:[%s1584_s8 + $0x8] sm:$0xff] }
 0x42b   :  { %v667_v35 = vadd.f32 %v663_v24, %v632_v55  ;;  %v668_v18 = vadd.f32 %v664_v25, %v634_v56 }
 0x42f   :  { %v670_v57 = vpop.permute.xlu0 %669 }
 0x433   :  { %v674_v22 = vpop.permute.xlu0 %673  ;;  %v672_v23 = vpop.permute.xlu1 %671 }
 0x434   :  { %v677_v26 = vsel %vm324_vm2, %v670_v57, %v674_v22  ;;  %v679_v2 = vsel %vm324_vm2, %v674_v22, %v670_v57  ;;  %v719_v57 = vld [vmem:[%s1584_s8] sm:$0xff] }
 0x435   :  { %v681_v61 = vmul.f32 %v677_v26, %v1323_v28  ;;  %v682_v33 = vmul.f32 %v679_v2, %v1325_v29  ;;  %v728_v26 = vld [vmem:[%s1585_s9 + $0x8] sm:$0xff] }
 0x437   :  { %v1507_v51 = vadd.f32 %v681_v61, %v665_v31  ;;  %v1509_v34 = vadd.f32 %v682_v33, %v666_v32  ;;  %v676_v17 = vpop.permute.xlu1 %675 }
 0x438   :  { %v678_v36 = vsel %vm324_vm2, %v672_v23, %v676_v17  ;;  %v680_v37 = vsel %vm324_vm2, %v676_v17, %v672_v23 }
 0x439   :  { %v683_v38 = vmul.f32 %v678_v36, %v1323_v28  ;;  %v684_v13 = vmul.f32 %v680_v37, %v1325_v29  ;;  %v689_v39 = vmul.f32 %v1507_v51, %v1343_v41  ;;  %v690_v14 = vmul.f32 %v1509_v34, %v1345_v42 }
 0x43b   :  { %v687_v40 = vadd.f32 %v683_v38, %v667_v35  ;;  %v688_v43 = vadd.f32 %v684_v13, %v668_v18  ;;  %v693_v27 = vadd.f32 %v690_v14, %v689_v39  ;;  %v699_v44 = vmul.f32 %v689_v39, %v1507_v51 }
 0x43c   :  { %v700_v30 = vmul.f32 %v690_v14, %v1509_v34 }
 0x43d   :  { %694 = vadd.xlane.f32.xlu0 %v693_v27  ;;  %v691_v45 = vmul.f32 %v687_v40, %v1343_v41  ;;  %v692_v46 = vmul.f32 %v688_v43, %v1345_v42 }
 0x43e   :  { %v703_v47 = vadd.f32 %v700_v30, %v699_v44 }
 0x43f   :  { %v696_v48 = vadd.f32 %v692_v46, %v691_v45  ;;  %v701_v49 = vmul.f32 %v691_v45, %v687_v40  ;;  %v702_v50 = vmul.f32 %v692_v46, %v688_v43 }
 0x441   :  { %704 = vadd.xlane.f32.xlu0 %v703_v47  ;;  %697 = vadd.xlane.f32.xlu1 %v696_v48  ;;  %v706_v60 = vadd.f32 %v702_v50, %v701_v49 }
 0x445   :  { %707 = vadd.xlane.f32.xlu0 %v706_v60 }
 0x4ca   :  { %v695_v52 = vpop.xlane.xlu0 %694 }
 0x4cb   :  { %v709_v62 = vmul.f32 0.00390625, %v695_v52 }
 0x4cd   :  { %v713_v55 = vmul.f32 %v709_v62, %v709_v62 }
 0x4ce   :  { %v705_v63 = vpop.xlane.xlu0 %704  ;;  %v698_v53 = vpop.xlane.xlu1 %697 }
 0x4cf   :  { %v711_v56 = vmul.f32 0.00390625, %v705_v63  ;;  %v710_v0 = vmul.f32 0.00390625, %v698_v53 }
 0x4d1   :  { %v715_v9 = vsub.f32 %v711_v56, %v713_v55  ;;  %v714_v5 = vmul.f32 %v710_v0, %v710_v0 }
 0x4d2   :  { %v708_v3 = vpop.xlane.xlu0 %707 }
 0x4d3   :  { %v717_v59 = vmax.f32 %v715_v9, 0.0  ;;  %v712_v7 = vmul.f32 0.00390625, %v708_v3 }
 0x4d5   :  { %v721_v1 = vadd.f32 1e-05, %v717_v59  ;;  %v716_v12 = vsub.f32 %v712_v7, %v714_v5 }
 0x4d7   :  { %1030 = vrsqrt.f32 %v721_v1  ;;  %v718_v19 = vmax.f32 %v716_v12, 0.0 }
 0x4d9   :  { %v722_v54 = vadd.f32 1e-05, %v718_v19 }
 0x4db   :  { %1032 = vrsqrt.f32 %v722_v54 }
 0x4e1   :  { %v1031_v58 = vpop.eup %1030 }
 0x4e2   :  { %v725_v20 = vmul.f32 %v1031_v58, %v719_v57 }
 0x4e4   :  { %735 = vperm.xlu1 %1020, %v725_v20   ;;  %v729_v22 = vmul.f32 %v725_v20, %v709_v62 }
 0x4e5   :  { %v1033_v23 = vpop.eup %1032 }
 0x4e6   :  { %v731_v24 = vsub.f32 %v727_v11, %v729_v22  ;;  %v726_v25 = vmul.f32 %v1033_v23, %v720_v21 }
 0x4e8   :  { %749 = vperm.xlu1 %1020, %v731_v24   ;;  %740 = vperm.xlu0 %1021, %v726_v25   ;;  %v730_v2 = vmul.f32 %v726_v25, %v710_v0 }
 0x4ea   :  { %v732_v31 = vsub.f32 %v728_v26, %v730_v2 }
 0x4ec   :  { %754 = vperm.xlu1 %1020, %v732_v31  }
 0x563   :  { %v736_v32 = vpop.permute.xlu1 %735 }
 0x564   :  { %v743_v17 = vmul.f32 %v736_v32, %v1507_v51  ;;  %v744_v35 = vmul.f32 %v736_v32, %v1509_v34  ;;  %v765_v51 = vld [vmem:[%s1586_s10] sm:$0x7]  ;;  %s1065_s10 = smov [#allocation4]  }
 0x567   :  { %v741_v61 = vpop.permute.xlu0 %740  ;;  %v750_v33 = vpop.permute.xlu1 %749 }
 0x568   :  { %v745_v18 = vmul.f32 %v741_v61, %v687_v40  ;;  %v746_v36 = vmul.f32 %v741_v61, %v688_v43  ;;  %v757_v37 = vadd.f32 %v750_v33, %v743_v17  ;;  %v758_v38 = vadd.f32 %v750_v33, %v744_v35  ;;  %v895_v61 = vld [vmem:[#allocation3] sm:$0x1] }
 0x56a   :  { %v761_v27 = vmax.f32 %v757_v37, 0.0  ;;  %v762_v44 = vmax.f32 %v758_v38, 0.0 }
 0x56b   :  { %v755_v13 = vpop.permute.xlu1 %754 }
 0x56c   :  { %v759_v39 = vadd.f32 %v755_v13, %v745_v18  ;;  %v760_v14 = vadd.f32 %v755_v13, %v746_v36  ;;  %v1064_v36 = vmov 1966171168  }
 0x56d   :  { %v926_v37 = vunpack.c.l.s4 %v1064_v36 }
 0x56e   :  { %v763_v30 = vmax.f32 %v759_v39, 0.0  ;;  %v764_v45 = vmax.f32 %v760_v14, 0.0 }
 0x570   :  { %v1004_v46 = vpack.c.bf16 %v763_v30, %v761_v27  ;;  %v1002_v47 = vpack.c.bf16 %v764_v45, %v762_v44  ;;  %v927_v27 = vunpack.c.0.s8 %v926_v37 }
 0x572   :  { %1003 = vmatprep.subr.bf16.mxu1 %v1002_v47  ;;  %v930_v47 = vsub.s32 %v927_v27, %v1286_v6 }
 0x573   :  { %1005 = vmatpush1.bf16.msra.mxu1 %v1004_v46 }
 0x576   :  { %977 = vmatmul.mubr.msk.f32.vlgmr.msra.gmra.mrb[16].mxu1 %vm766_vm4, %v765_v51 }
 0x649   :  { %v836_v34 = vpop.f32.mrb[16].mxu1 }
 0x64a   :  { %v838_v40 = vpop.f32.mrb[17].mxu1  ;;  %841 = vrot.lane.b32.xlu0 %v836_v34, %s1061_s0  ;;  %v857_v43 = vrot.slane %v836_v34, 2  ;;  %v851_v55 = vrot.slane %v836_v34, 1 }
 0x64b   :  { %843 = vrot.lane.b32.xlu1 %v838_v40, %s1061_s0  ;;  %v858_v48 = vrot.slane %v838_v40, 2  ;;  %v852_v56 = vrot.slane %v838_v40, 1  ;;  %s951_s0 = sshll.u32 %s1065_s10, 4  ;;  %s952_s0 = int_to_ptr.vmem [resolvable:$true] %s951_s0 }
 0x64c   :  { %p1041_p1 = scmp.lt.s32.totalorder %s952_s0, %s952_s0 }
 0x64e   :  { %861 = vrot.lane.b32.xlu0 %v857_v43, %s1062_s27 }
 0x64f   :  { %863 = vrot.lane.b32.xlu1 %v858_v48, %s1062_s27  ;;  %s1036_s27 = scalar_lea.vmem %s952_s0, 32 }
 0x650   :  { %p1037_p0 = scmp.ne.s32.totalorder %s952_s0, %s1036_s27  ;;  %p1042_p2 = scmp.lt.s32.totalorder %s1036_s27, %s1036_s27 }
 0x652   :  { %p1043_p3 = por %p1042_p2, %p1041_p1 }
 0x654   :  { %p1044_p4 = pnand %p1043_p3, %p1037_p0 }
 0x6bc   :  { %v842_v49 = vpop.permute.xlu0 %841 }
 0x6bd   :  { %v844_v50 = vpop.permute.xlu1 %843 }
 0x6be   :  { %v845_v60 = vsel %vm272_vm1, %v842_v49, %v844_v50  ;;  %v846_v52 = vsel %vm272_vm1, %v844_v50, %v842_v49 }
 0x6bf   :  { %v847_v62 = vmul.f32 %v846_v52, %v1300_v15  ;;  %v848_v63 = vmul.f32 %v845_v60, %v1302_v16 }
 0x6c0   :  { %v862_v53 = vpop.permute.xlu0 %861 }
 0x6c1   :  { %v864_v0 = vpop.permute.xlu1 %863  ;;  %v855_v59 = vadd.f32 %v851_v55, %v847_v62  ;;  %v856_v5 = vadd.f32 %v852_v56, %v848_v63 }
 0x6c2   :  { %v865_v9 = vsel %vm324_vm2, %v862_v53, %v864_v0  ;;  %v866_v3 = vsel %vm324_vm2, %v864_v0, %v862_v53 }
 0x6c3   :  { %v867_v7 = vmul.f32 %v865_v9, %v1323_v28  ;;  %v868_v1 = vmul.f32 %v866_v3, %v1325_v29 }
 0x6c5   :  { %v869_v12 = vadd.f32 %v867_v7, %v855_v59  ;;  %v870_v15 = vadd.f32 %v868_v1, %v856_v5 }
 0x6c7   :  { %v871_v16 = vmul.f32 %v869_v12, %v1343_v41  ;;  %v872_v19 = vmul.f32 %v870_v15, %v1345_v42  ;;  %v891_v42 = vld [vmem:[#allocation2] sm:$0x1] }
 0x6c9   :  { %v874_v54 = vsel %vm873_vm5, %v871_v16, 0.0  ;;  %v875_v57 = vsel %vm873_vm5, %v872_v19, 0.0  ;;  %v879_v58 = vmul.f32 %v871_v16, %v869_v12  ;;  %v880_v20 = vmul.f32 %v872_v19, %v870_v15 }
 0x6ca   :  { %v876_v11 = vadd.f32 %v875_v57, %v874_v54 }
 0x6cb   :  { %v881_v8 = vsel %vm873_vm5, %v879_v58, 0.0  ;;  %v882_v21 = vsel %vm873_vm5, %v880_v20, 0.0 }
 0x6cc   :  { %877 = vadd.xlane.f32.xlu0 %v876_v11  ;;  %v883_v22 = vadd.f32 %v882_v21, %v881_v8 }
 0x6ce   :  { %884 = vadd.xlane.f32.xlu1 %v883_v22 }
 0x759   :  { %v878_v28 = vpop.xlane.xlu0 %877 }
 0x75a   :  { %v886_v23 = vmul.f32 0.00390625, %v878_v28 }
 0x75b   :  { %v885_v29 = vpop.xlane.xlu1 %884 }
 0x75c   :  { %v888_v24 = vmul.f32 %v886_v23, %v886_v23  ;;  %v887_v25 = vmul.f32 0.00390625, %v885_v29 }
 0x75e   :  { %v889_v26 = vsub.f32 %v887_v25, %v888_v24 }
 0x760   :  { %v890_v2 = vmax.f32 %v889_v26, 0.0 }
 0x762   :  { %v892_v41 = vadd.f32 1e-05, %v890_v2 }
 0x764   :  { %1034 = vrsqrt.f32 %v892_v41 }
 0x76e   :  { %v1035_v31 = vpop.eup %1034 }
 0x76f   :  { %v894_v32 = vmul.f32 %v1035_v31, %v891_v42 }
 0x771   :  { %900 = vperm.xlu0 %1021, %v894_v32   ;;  %v896_v33 = vmul.f32 %v894_v32, %v886_v23 }
 0x773   :  { %v897_v17 = vsub.f32 %v895_v61, %v896_v33 }
 0x775   :  { %911 = vperm.xlu1 %1020, %v897_v17  }
 0x7f0   :  { %v901_v35 = vpop.permute.xlu0 %900 }
 0x7f1   :  { %v906_v18 = vrot.slane %v901_v35, %v1292_v10 }
 0x7f3   :  { %v907_v13 = vmul.f32 %v906_v18, %v869_v12  ;;  %v908_v39 = vmul.f32 %v906_v18, %v870_v15 }
 0x7f4   :  { %v912_v38 = vpop.permute.xlu1 %911 }
 0x7f5   :  { %v917_v14 = vrot.slane %v912_v38, %v1292_v10 }
 0x7f7   :  { %v918_v44 = vadd.f32 %v917_v14, %v907_v13  ;;  %v919_v30 = vadd.f32 %v917_v14, %v908_v39 }
 0x7f9   :  { %v920_v45 = vmax.f32 %v918_v44, 0.0  ;;  %v921_v46 = vmax.f32 %v919_v30, 0.0 }
 0x7fb   :  { %v924_v51 = vcombine.low %v920_v45, %v921_v46 }
 0x7fd   :  { %v931_v34 = vrot.slane %v924_v51, %v930_v47 }
 0x7ff   :  { %v938_v40 = vrot.slane %v931_v34, %v930_v47 }
 0x801   :  { %944 = vst.msk [vmem:[#allocation4] sm:$0x3] %vm942_vm6, %v938_v40 }
 0x802   :  { %1047 = shalt.err (!%p1044_p4)
}
 0x803   :  { %s1048_s23 = scalar_lea.hbm %s1588_s13, 32 }
 0x804   :  { %p1049_p5 = scmp.ne.s32.totalorder %s1588_s13, %s1048_s23  ;;  %p1052_p6 = scmp.lt.u32.totalorder %s1048_s23, %s1588_s13 }
 0x806   :  { %p1054_p7 = pnand %p1052_p6, %p1049_p5 }
 0x808   :  { %1057 = shalt.err (!%p1054_p7)
}
 0x809   :  { %954 = dma.vmem_to_hbm [thread:$0]  %s952_s0, 32, %s1588_s13, [#allocation5]  }
 0x80a   :  { %1058 = dma.done.wait [#allocation5], 32  }
 0x80b   :  { %1059 = vsyncadd [#allocation5], 4294967264 }
 0x80c   :  { %958 = vsyncpa [#allocation5], 1 }

</bundles_post_ra>
